<compile_context>
chip_gen: v7x
topology: tpu7x:2x2x1
jax: 0.10.0
libtpu: 0.0.40
codegen_flags: <defaults>
</compile_context>

<pallas_src>
import jax
import jax.numpy as jnp
from jax.experimental import pallas as pl
from jax.experimental.pallas import tpu as pltpu


_VMEM_LIMIT_BYTES = 32 * 1024 * 1024      # safe on v5e/v6e/v7x, above defaults
_BLOCK_BUDGET_BYTES = 4 * 1024 * 1024     # per (C, hw_tile) block


def _pick_hw_tile(hw, row_bytes, budget_bytes=_BLOCK_BUDGET_BYTES):
    """Largest HW tile that divides HW, is a multiple of 128 (lane-dense
    stores) and keeps one (C, tile) block under `budget_bytes`.  Falls back to
    the full HW extent (always a legal block) when HW isn't 128-divisible."""
    if hw * row_bytes <= budget_bytes or hw % 128 != 0:
        return hw
    tile = max(128, (budget_bytes // row_bytes) // 128 * 128)
    while hw % tile:
        tile -= 128
    return tile


def se_layer(x, w1, b1, w2, b2):
    """x: (B, C, H, W). Linear weights stored as (in, out): w1 (C, hidden),
    b1 (hidden,), w2 (hidden, C), b2 (C,). Returns (B, C, H, W)."""
    B, C, H, W = x.shape
    hidden = w1.shape[1]
    HW = H * W
    inv_hw = 1.0 / float(HW)   # mean divides by the true H*W (no padded tiles)

    x_flat = x.reshape(B, C, HW)
    # Column-vector layout for the excitation so neither kernel transposes:
    #   h = relu(W1c @ mean + b1c), s = W2c @ h + b2c, all (rows, 1) vectors.
    w1c = jnp.transpose(w1)            # (hidden, C)
    w2c = jnp.transpose(w2)            # (C, hidden)
    b1c = b1.reshape(hidden, 1)
    b2c = b2.reshape(C, 1)

    elem_bytes = jnp.dtype(x.dtype).itemsize
    hw_tile = _pick_hw_tile(HW, C * elem_bytes)
    n_hw = HW // hw_tile

    # ---- Pass 1: global average pool + excitation -> per-channel gates ----
    def gate_kernel(x_ref, w1_ref, b1_ref, w2_ref, b2_ref, g_ref, acc_ref):
        j = pl.program_id(1)

        @pl.when(j == 0)
        def _init():
            acc_ref[...] = jnp.zeros_like(acc_ref)

        # x_ref: (C, hw_tile).  Accumulate spatial sums in f32 (read-only path;
        # the big store path in pass 2 stays in the input dtype).
        acc_ref[...] += jnp.sum(x_ref[...].astype(jnp.float32), axis=-1,
                                keepdims=True)

        @pl.when(j == pl.num_programs(1) - 1)
        def _finalize():
            mean = acc_ref[...] * inv_hw                          # (C, 1)
            h = jnp.dot(w1_ref[...], mean,
                        preferred_element_type=jnp.float32) + b1_ref[...]
            h = jnp.maximum(h, 0.0)                               # (hidden, 1)
            s = jnp.dot(w2_ref[...], h,
                        preferred_element_type=jnp.float32) + b2_ref[...]
            # Exact sigmoid; op count is only C per batch element (negligible),
            # so no EUP-approx reciprocal to avoid perturbing the gate values.
            g_ref[...] = 1.0 / (1.0 + jnp.exp(-s))                # (C, 1)

    gates = pl.pallas_call(
        gate_kernel,
        out_shape=jax.ShapeDtypeStruct((B, C, 1), jnp.float32),
        grid_spec=pltpu.PrefetchScalarGridSpec(
            num_scalar_prefetch=0,
            grid=(B, n_hw),
            in_specs=[
                pl.BlockSpec((None, C, hw_tile), lambda b, j: (b, 0, j)),
                pl.BlockSpec((hidden, C), lambda b, j: (0, 0)),
                pl.BlockSpec((hidden, 1), lambda b, j: (0, 0)),
                pl.BlockSpec((C, hidden), lambda b, j: (0, 0)),
                pl.BlockSpec((C, 1), lambda b, j: (0, 0)),
            ],
            out_specs=pl.BlockSpec((None, C, 1), lambda b, j: (b, 0, 0)),
            scratch_shapes=[pltpu.VMEM((C, 1), jnp.float32)],
        ),
        compiler_params=pltpu.CompilerParams(
            dimension_semantics=("parallel", "arbitrary"),
            vmem_limit_bytes=_VMEM_LIMIT_BYTES),
    )(x_flat, w1c, b1c, w2c, b2c)

    # ---- Pass 2: lane-dense channel-wise rescale ----
    def scale_kernel(g_ref, x_ref, o_ref):
        x_blk = x_ref[...]                                    # (C, hw_tile)
        o_ref[...] = x_blk * g_ref[...].astype(x_blk.dtype)   # (C, 1) broadcast

    out_flat = pl.pallas_call(
        scale_kernel,
        out_shape=jax.ShapeDtypeStruct((B, C, HW), x.dtype),
        grid_spec=pltpu.PrefetchScalarGridSpec(
            num_scalar_prefetch=0,
            grid=(B, n_hw),
            in_specs=[
                pl.BlockSpec((None, C, 1), lambda b, j: (b, 0, 0)),
                pl.BlockSpec((None, C, hw_tile), lambda b, j: (b, 0, j)),
            ],
            out_specs=pl.BlockSpec((None, C, hw_tile), lambda b, j: (b, 0, j)),
        ),
        compiler_params=pltpu.CompilerParams(
            dimension_semantics=("parallel", "parallel"),
            vmem_limit_bytes=_VMEM_LIMIT_BYTES),
    )(gates, x_flat)

    return out_flat.reshape(B, C, H, W)


def se_layer_ref(x, w1, b1, w2, b2):
    """Pure-JAX reference matching the PyTorch module."""
    y = jnp.mean(x, axis=(2, 3))                      # (B, C)
    h = jnp.maximum(y @ w1 + b1, 0.0)                 # (B, hidden)
    s = jax.nn.sigmoid(h @ w2 + b2)                   # (B, C)
    return x * s[:, :, None, None]


if __name__ == "__main__":
    # Small shapes consistent with SELayer(channel=64, reduction=16); H=W=16
    # so the flattened spatial axis (256) is lane-dense (multiple of 128).
    B, C, H, W = 2, 64, 16, 16
    reduction = 16
    hidden = C // reduction  # 4

    key = jax.random.PRNGKey(0)
    k_x, k_w1, k_b1, k_w2, k_b2 = jax.random.split(key, 5)

    x = jax.random.normal(k_x, (B, C, H, W), dtype=jnp.float32)
    # Deterministic parameter init (synthetic; mimics small uniform init).
    w1 = jax.random.uniform(k_w1, (C, hidden), jnp.float32, -0.1, 0.1)
    b1 = jax.random.uniform(k_b1, (hidden,), jnp.float32, -0.1, 0.1)
    w2 = jax.random.uniform(k_w2, (hidden, C), jnp.float32, -0.1, 0.1)
    b2 = jax.random.uniform(k_b2, (C,), jnp.float32, -0.1, 0.1)

    out = se_layer(x, w1, b1, w2, b2)
    jax.block_until_ready(out)

    ref = se_layer_ref(x, w1, b1, w2, b2)
    assert out.shape == (B, C, H, W)
    assert jnp.allclose(out, ref, atol=1e-5, rtol=1e-5), "mismatch vs reference"

    print("KERNEL_OK")
</pallas_src>

<mosaic_0001>
module attributes {stable_mosaic.version = 11 : i64} {
  func.func @gate_kernel(%arg0: i32, %arg1: i32, %arg2: memref<1x64x256xf32, #tpu.memory_space<vmem>>, %arg3: memref<4x64xf32, #tpu.memory_space<vmem>>, %arg4: memref<4x1xf32, #tpu.memory_space<vmem>>, %arg5: memref<64x4xf32, #tpu.memory_space<vmem>>, %arg6: memref<64x1xf32, #tpu.memory_space<vmem>>, %arg7: memref<1x64x1xf32, #tpu.memory_space<vmem>>, %arg8: memref<64x1xf32, #tpu.memory_space<vmem>>) attributes {dimension_semantics = [#tpu.dimension_semantics<parallel>, #tpu.dimension_semantics<arbitrary>], iteration_bounds = array<i64: 2, 1>, scalar_prefetch = 0 : i64, scratch_operands = 1 : i64, tpu.core_type = #tpu.core_type<tc>, window_params = [{transform_indices = @transform_0, window_bounds = array<i64: 1, 64, 256>}, {pipeline_mode = #tpu.pipeline_mode<synchronous>, transform_indices = @transform_1, window_bounds = array<i64: 4, 64>}, {pipeline_mode = #tpu.pipeline_mode<synchronous>, transform_indices = @transform_2, window_bounds = array<i64: 4, 1>}, {pipeline_mode = #tpu.pipeline_mode<synchronous>, transform_indices = @transform_3, window_bounds = array<i64: 64, 4>}, {pipeline_mode = #tpu.pipeline_mode<synchronous>, transform_indices = @transform_4, window_bounds = array<i64: 64, 1>}, {transform_indices = @transform_5, window_bounds = array<i64: 1, 64, 1>}]} {
    %c0_i32 = arith.constant 0 : i32
    %0 = arith.cmpi eq, %arg1, %c0_i32 : i32
    %1 = arith.extui %0 : i1 to i32
    %c0_i32_0 = arith.constant 0 : i32
    %2 = arith.cmpi ne, %1, %c0_i32_0 : i32
    scf.if %2 {
      %cst_9 = arith.constant 0.000000e+00 : f32
      %13 = vector.broadcast %cst_9 : f32 to vector<64x1xf32>
      %c0_10 = arith.constant 0 : index
      %c0_11 = arith.constant 0 : index
      %14 = vector.load %arg8[%c0_10, %c0_11] : memref<64x1xf32, #tpu.memory_space<vmem>>, vector<64x1xf32>
      tpu.vector_store %arg8[%c0_10, %c0_11], %13 {strides = array<i32>} : memref<64x1xf32, #tpu.memory_space<vmem>>, vector<64x1xf32>,
    } else {
    }
    %c0 = arith.constant 0 : index
    %c0_1 = arith.constant 0 : index
    %3 = vector.load %arg8[%c0, %c0_1] : memref<64x1xf32, #tpu.memory_space<vmem>>, vector<64x1xf32>
    %c0_2 = arith.constant 0 : index
    %c0_3 = arith.constant 0 : index
    %c0_4 = arith.constant 0 : index
    %4 = vector.load %arg2[%c0_2, %c0_3, %c0_4] : memref<1x64x256xf32, #tpu.memory_space<vmem>>, vector<1x64x256xf32>
    %5 = vector.shape_cast %4 : vector<1x64x256xf32> to vector<64x256xf32>
    %cst = arith.constant dense<0.000000e+00> : vector<64xf32>
    %6 = vector.multi_reduction <add>, %5, %cst [1] : vector<64x256xf32> to vector<64xf32>
    %7 = vector.shape_cast %6 : vector<64xf32> to vector<64x1xf32>
    %8 = arith.addf %3, %7 : vector<64x1xf32>
    %c0_5 = arith.constant 0 : index
    %c0_6 = arith.constant 0 : index
    %9 = vector.load %arg8[%c0_5, %c0_6] : memref<64x1xf32, #tpu.memory_space<vmem>>, vector<64x1xf32>
    tpu.vector_store %arg8[%c0_5, %c0_6], %8 {strides = array<i32>} : memref<64x1xf32, #tpu.memory_space<vmem>>, vector<64x1xf32>,
    %c0_i32_7 = arith.constant 0 : i32
    %10 = arith.cmpi eq, %arg1, %c0_i32_7 : i32
    %11 = arith.extui %10 : i1 to i32
    %c0_i32_8 = arith.constant 0 : i32
    %12 = arith.cmpi ne, %11, %c0_i32_8 : i32
    scf.if %12 {
      %c0_9 = arith.constant 0 : index
      %c0_10 = arith.constant 0 : index
      %13 = vector.load %arg8[%c0_9, %c0_10] : memref<64x1xf32, #tpu.memory_space<vmem>>, vector<64x1xf32>
      %cst_11 = arith.constant 3.906250e-03 : f32
      %14 = vector.broadcast %cst_11 : f32 to vector<64x1xf32>
      %15 = arith.mulf %13, %14 : vector<64x1xf32>
      %c0_12 = arith.constant 0 : index
      %c0_13 = arith.constant 0 : index
      %16 = vector.load %arg3[%c0_12, %c0_13] : memref<4x64xf32, #tpu.memory_space<vmem>>, vector<4x64xf32>
      %cst_14 = arith.constant dense<0.000000e+00> : vector<4x1xf32>
      %17 = tpu.matmul %16, %15, %cst_14 {dimension_numbers = #tpu.dot_dimension_numbers<[1], [0], [0], [1], [0, 0, 1, 1], [], []>} : vector<4x64xf32>, vector<64x1xf32>, vector<4x1xf32> -> vector<4x1xf32>
      %c0_15 = arith.constant 0 : index
      %c0_16 = arith.constant 0 : index
      %18 = vector.load %arg4[%c0_15, %c0_16] : memref<4x1xf32, #tpu.memory_space<vmem>>, vector<4x1xf32>
      %19 = arith.addf %17, %18 : vector<4x1xf32>
      %cst_17 = arith.constant 0.000000e+00 : f32
      %20 = vector.broadcast %cst_17 : f32 to vector<4x1xf32>
      %21 = arith.maximumf %19, %20 : vector<4x1xf32>
      %c0_18 = arith.constant 0 : index
      %c0_19 = arith.constant 0 : index
      %22 = vector.load %arg5[%c0_18, %c0_19] : memref<64x4xf32, #tpu.memory_space<vmem>>, vector<64x4xf32>
      %cst_20 = arith.constant dense<0.000000e+00> : vector<64x1xf32>
      %23 = tpu.matmul %22, %21, %cst_20 {dimension_numbers = #tpu.dot_dimension_numbers<[1], [0], [0], [1], [0, 0, 1, 1], [], []>} : vector<64x4xf32>, vector<4x1xf32>, vector<64x1xf32> -> vector<64x1xf32>
      %c0_21 = arith.constant 0 : index
      %c0_22 = arith.constant 0 : index
      %24 = vector.load %arg6[%c0_21, %c0_22] : memref<64x1xf32, #tpu.memory_space<vmem>>, vector<64x1xf32>
      %25 = arith.addf %23, %24 : vector<64x1xf32>
      %cst_23 = arith.constant 0.000000e+00 : f32
      %26 = vector.broadcast %cst_23 : f32 to vector<64x1xf32>
      %27 = arith.subf %26, %25 : vector<64x1xf32>
      %28 = math.exp %27 : vector<64x1xf32>
      %cst_24 = arith.constant 1.000000e+00 : f32
      %29 = vector.broadcast %cst_24 : f32 to vector<64x1xf32>
      %30 = arith.addf %29, %28 : vector<64x1xf32>
      %cst_25 = arith.constant 1.000000e+00 : f32
      %31 = vector.broadcast %cst_25 : f32 to vector<64x1xf32>
      %32 = arith.divf %31, %30 : vector<64x1xf32>
      %c0_26 = arith.constant 0 : index
      %c0_27 = arith.constant 0 : index
      %c0_28 = arith.constant 0 : index
      %33 = vector.load %arg7[%c0_26, %c0_27, %c0_28] : memref<1x64x1xf32, #tpu.memory_space<vmem>>, vector<1x64x1xf32>
      %34 = vector.shape_cast %33 : vector<1x64x1xf32> to vector<64x1xf32>
      %35 = vector.shape_cast %32 : vector<64x1xf32> to vector<1x64x1xf32>
      tpu.vector_store %arg7[%c0_26, %c0_27, %c0_28], %35 {strides = array<i32>} : memref<1x64x1xf32, #tpu.memory_space<vmem>>, vector<1x64x1xf32>,
    } else {
    }
    return
  }
  func.func @transform_0(%arg0: i32, %arg1: i32) -> (i32, i32, i32) {
    %c0_i32 = arith.constant 0 : i32
    %c0_i32_0 = arith.constant 0 : i32
    return %arg0, %c0_i32, %arg1 : i32, i32, i32
  }
  func.func @transform_1(%arg0: i32, %arg1: i32) -> (i32, i32) {
    %c0_i32 = arith.constant 0 : i32
    %c0_i32_0 = arith.constant 0 : i32
    %c0_i32_1 = arith.constant 0 : i32
    return %c0_i32, %c0_i32_0 : i32, i32
  }
  func.func @transform_2(%arg0: i32, %arg1: i32) -> (i32, i32) {
    %c0_i32 = arith.constant 0 : i32
    %c0_i32_0 = arith.constant 0 : i32
    %c0_i32_1 = arith.constant 0 : i32
    return %c0_i32, %c0_i32_0 : i32, i32
  }
  func.func @transform_3(%arg0: i32, %arg1: i32) -> (i32, i32) {
    %c0_i32 = arith.constant 0 : i32
    %c0_i32_0 = arith.constant 0 : i32
    %c0_i32_1 = arith.constant 0 : i32
    return %c0_i32, %c0_i32_0 : i32, i32
  }
  func.func @transform_4(%arg0: i32, %arg1: i32) -> (i32, i32) {
    %c0_i32 = arith.constant 0 : i32
    %c0_i32_0 = arith.constant 0 : i32
    %c0_i32_1 = arith.constant 0 : i32
    return %c0_i32, %c0_i32_0 : i32, i32
  }
  func.func @transform_5(%arg0: i32, %arg1: i32) -> (i32, i32, i32) {
    %c0_i32 = arith.constant 0 : i32
    %c0_i32_0 = arith.constant 0 : i32
    %c0_i32_1 = arith.constant 0 : i32
    return %arg0, %c0_i32, %c0_i32_0 : i32, i32, i32
  }
}

</mosaic_0001>

<bundles_post_ra>
// kernel: tpu_custom_call.1
= control target key start
LH: loop header
LB: loop body
LE: loop exit
PB: predicated region body
PF: predicated region fallthrough
CT: control target
= control target key end

     0   :  { %10 = vsyncpa [#allocation4], 0  ;;  %s1246_s0 = inlined_call_operand.hbm [shape: f32[2,64,256], index: 0, kind: input, shape index: {}]   ;;  %s1247_s1 = inlined_call_operand.vmem [shape: f32[4,64], index: 1, kind: input, shape index: {}]   ;;  %s1248_s2 = inlined_call_operand.vmem [shape: f32[4,1], index: 2, kind: input, shape index: {}]   ;;  %s1249_s3 = inlined_call_operand.vmem [shape: f32[64,4], index: 3, kind: input, shape index: {}]   ;;  %s1250_s4 = inlined_call_operand.vmem [shape: f32[64,1], index: 4, kind: input, shape index: {}]   ;;  %s1251_s5 = inlined_call_operand.vmem [shape: f32[2,64,1], index: 5, kind: output, shape index: {}]  }
   0x1   :  { %12 = vsyncpa [#allocation4 + $0x1], 0  ;;  %s1018_s18 = smov 0   ;;  %s1020_s19 = smov 0  }
   0x2   :  { %s1022_s20 = smov 0   ;;  %s1024_s21 = smov 0  }
   0x3   :  { %s1026_s22 = smov 0   ;;  %s1028_s23 = smov 0  }
   0x4 LB: > { %s720_s24 = sadd.s32 4294967295, %s980_s23   ;;  %s30_s25 = sadd.s32 1, %s976_s22  ;;  %s980_s23 = sphi %s1028_s23, %s18_s23   ;;  %s976_s22 = sphi %s1026_s22, %s1259_s22   ;;  %s972_s21 = sphi %s1024_s21, %s1258_s21   ;;  %s968_s20 = sphi %s1022_s20, %s1257_s20   ;;  %s964_s19 = sphi %s1020_s19, %s1256_s19   ;;  %s960_s18 = sphi %s1018_s18, %s1255_s18  }
   0x5   : > { %p32_p0 = scmp.ge.s32.totalorder %s30_s25, 2  ;;  %s39_s26 = sadd.s32 1, %s968_s20 }
   0x6   : > { %p46_p1 = scmp.ne.s32.totalorder %s968_s20, %s964_s19  ;;  %p47_p2 = scmp.eq.s32.totalorder %s980_s23, 0 }
   0x7   : > { %s1261_s25 = smov (%p32_p0, %s30_s25), 0  ;;  %p52_p4 = scmp.ne.s32.totalorder %s964_s19, %s960_s18 }
   0x8   : > { %p1054_p3 = por %p47_p2, %p46_p1  ;;  %s34_s28 = ssub.s32 %s976_s22, %s1261_s25 }
   0x9   : > { %p53_p5 = scmp.eq.s32.totalorder %s720_s24, 0  ;;  %p37_p6 = scmp.eq.s32.totalorder %s34_s28, 0 }
   0xa   : > { %p814_p8 = scmp.lt.s32.totalorder %s980_s23, 2  ;;  %s198_s6 = sand.u32 1, %s968_s20  }
   0xb   : > { %p1061_p7 = por %p53_p5, %p52_p4  ;;  %s743_s7 = sshll.u32 %s976_s22, 11 }
   0xc   : > { %s1067_s30 = scalar_select %p37_p6, %s968_s20, %s39_s26  }
   0xd   : > { %s724_s8 = sshll.u32 %s198_s6, 7  ;;  %s1074_s11 = scalar_lea.hbm %s1246_s0, %s743_s7 }
   0xe   : > { %s202_s12 = scalar_lea.vmem [#allocation3], %s724_s8  ;;  %p1078_p9 = pnand %p814_p8, %p1054_p3 }
   0xf   : > { %s211_s13 = sshll.u32 %s202_s12, 4  ;;  %s1084_s15 = scalar_lea.sflag [#allocation4], %s198_s6  ;;  %s1082_s13 = int_to_ptr.vmem [resolvable:$true] %s211_s13 }
  0x10   : > { %s900_s16 = scalar_lea.hbm %s1074_s11, 2048  ;;  %p902_p11 = pneg %p1078_p9 }
  0x11   : > { %p901_p10 = scmp.ne.s32.totalorder %s1074_s11, %s900_s16  ;;  %s905_s24 = scalar_lea.hbm %s1246_s0, 4096 }
  0x12   : > { %p906_p0 = scmp.lt.u32.totalorder %s1074_s11, %s1246_s0  ;;  %p907_p1 = scmp.lt.u32.totalorder %s905_s24, %s900_s16 }
  0x13   : > { %p903_p12 = pnand %p902_p11, %p901_p10  ;;  %p909_p3 = scmp.lt.u32.totalorder %s900_s16, %s1074_s11 }
  0x14   : > { %p908_p2 = por %p907_p1, %p906_p0 }
  0x15   : > { %p904_p13 = pneg %p903_p12 }
  0x16   : > { %p910_p4 = por %p909_p3, %p908_p2 }
  0x18   : > { %p911_p5 = pnand %p910_p4, %p904_p13 }
  0x1a   : > { %914 = shalt.err (!%p911_p5)
}
  0x1b   : > { %s915_s28 = scalar_lea.vmem %s1082_s13, 2048  ;;  %s982_s6 = smov [#allocation3]  }
  0x1c   : > { %p916_p6 = scmp.ne.s32.totalorder %s1082_s13, %s915_s28  ;;  %s920_s7 = sshll.u32 %s982_s6, 4  ;;  %s921_s7 = int_to_ptr.vmem [resolvable:$false] %s920_s7 }
  0x1d   : > { %s922_s8 = scalar_lea.vmem %s921_s7, 4096  ;;  %p923_p12 = scmp.lt.s32.totalorder %s1082_s13, %s921_s7 }
  0x1e   : > { %p918_p8 = pnand %p916_p6, %p902_p11  ;;  %p924_p0 = scmp.lt.s32.totalorder %s922_s8, %s915_s28 }
  0x20   : > { %p919_p10 = pneg %p918_p8  ;;  %p925_p1 = por %p924_p0, %p923_p12 }
  0x22   : > { %p926_p2 = pnand %p925_p1, %p919_p10 }
  0x24   : > { %929 = shalt.err (!%p926_p2)
}
  0x25   : > { %s983_s9 = smov 256   ;;  %s984_s10 = smov 16  }
  0x26   : > { %813 = dma.hbm_to_vmem [thread:$0]  (!%p1078_p9), %s1074_s11, 2048, %s1082_s13, %s1084_s15, %s983_s9, %s983_s9, %s984_s10  }
  0x27   : > { %p727_p11 = scmp.ge.s32.totalorder %s980_s23, 1  ;;  %p219_p13 = scmp.lt.s32.totalorder %s980_s23, 3 }
  0x29   : > { %p220_p3 = pnand %p727_p11, %p219_p13 }
  0x2a   : > { %s225_s12 = sand.u32 (!%p220_p3), 1, %s964_s19  }
  0x2b   : > { %223 = sbr.rel (%p220_p3) target bundleno = 706 (0x2c2), region = 40  ;;  %s728_s16 = sshll.u32 (!%p220_p3), %s225_s12, 7 }
  0x2c   : > { %s226_s17 = scalar_lea.sflag (!%p220_p3), [#allocation4], %s225_s12  ;;  %s1115_s18 = scalar_lea.vmem (!%p220_p3), [#allocation3], %s728_s16 }
  0x32   : > { %955 = dma.done.wait (%p1061_p7), %s226_s17, 2048  }
  0x33   : > { %957 = vsyncadd (%p1061_p7), %s226_s17, 4294965248  ;;  %vm266_vm0 = vcmask 7168   ;;  %v985_v0 = vmov 0.0   ;;  %v287_v1 = vld [vmem:[%s1115_s18 + $0x20] sm:$0xff]  ;;  %v288_v2 = vld [vmem:[%s1115_s18 + $0x28] sm:$0xff]  ;;  %v986_v25 = vmov 0.0|0.0  }
  0x34   : > { %269 = vst.msk [vmem:[#allocation2 + $0x10] sm:$0xff] %vm266_vm0, %v985_v0  ;;  %267 = vst.msk [vmem:[#allocation2] sm:$0xff] %vm266_vm0, %v985_v0  ;;  %v283_v3 = vld [vmem:[%s1115_s18] sm:$0xff]  ;;  %v305_v4 = vadd.f32 %v288_v2, %v287_v1  ;;  %v284_v5 = vld [vmem:[%s1115_s18 + $0x8] sm:$0xff]  ;;  %796 = vmatprep.subr.bf16.mxu0 %v986_v25  ;;  %vm987_vm1 = vmmov 0   ;;  %vm361_vm2 = vcmask 523264  }
  0x35   : > { %268 = vst.msk [vmem:[#allocation2 + $0x8] sm:$0xff] %vm266_vm0, %v985_v0  ;;  %270 = vst.msk [vmem:[#allocation2 + $0x18] sm:$0xff] %vm266_vm0, %v985_v0  ;;  %v289_v6 = vld [vmem:[%s1115_s18 + $0x30] sm:$0xff]  ;;  %v290_v7 = vld [vmem:[%s1115_s18 + $0x38] sm:$0xff]  ;;  %v299_v8 = vadd.f32 %v284_v5, %v283_v3  ;;  %779 = vmatprep.mubr.msk.f32.mxu0 %vm987_vm1, %v985_v0  ;;  %vm452_vm3 = vcmask 31744   ;;  %vm477_vm4 = vcmask 1043456  }
  0x36   : > { %271 = vst.msk [vmem:[#allocation2 + $0x20] sm:$0xff] %vm266_vm0, %v985_v0  ;;  %272 = vst.msk [vmem:[#allocation2 + $0x28] sm:$0xff] %vm266_vm0, %v985_v0  ;;  %v285_v9 = vld [vmem:[%s1115_s18 + $0x10] sm:$0xff]  ;;  %v286_v10 = vld [vmem:[%s1115_s18 + $0x18] sm:$0xff]  ;;  %306 = vadd.xlane.f32.xlu1 %v305_v4  ;;  %v308_v11 = vadd.f32 %v290_v7, %v289_v6  ;;  %p257_p7 = scmp.lt.s32.totalorder %s972_s21, 1 }
  0x37   : > { %273 = vst.msk [vmem:[#allocation2 + $0x30] sm:$0xff] %vm266_vm0, %v985_v0  ;;  %274 = vst.msk [vmem:[#allocation2 + $0x38] sm:$0xff] %vm266_vm0, %v985_v0  ;;  %300 = vadd.xlane.f32.xlu0 %v299_v8  ;;  %v302_v12 = vadd.f32 %v286_v10, %v285_v9  ;;  %v293_v13 = vld [vmem:[%s1115_s18 + $0x50] sm:$0xff]  ;;  %v294_v14 = vld [vmem:[%s1115_s18 + $0x58] sm:$0xff] }
  0x38   : > { %v291_v15 = vld [vmem:[%s1115_s18 + $0x40] sm:$0xff]  ;;  %v292_v16 = vld [vmem:[%s1115_s18 + $0x48] sm:$0xff]  ;;  %v314_v17 = vadd.f32 %v294_v14, %v293_v13  ;;  %v297_v19 = vld [vmem:[%s1115_s18 + $0x70] sm:$0xff]  ;;  %s1263_s21 = smov (!%p257_p7, %s972_s21), 1 }
  0x39   : > { %v311_v18 = vadd.f32 %v292_v16, %v291_v15  ;;  %v298_v20 = vld [vmem:[%s1115_s18 + $0x78] sm:$0xff]  ;;  %v295_v21 = vld [vmem:[%s1115_s18 + $0x60] sm:$0xff]  ;;  %v296_v22 = vld [vmem:[%s1115_s18 + $0x68] sm:$0xff]  ;;  %s744_s29 = sshll.u32 %s1263_s21, 6 }
  0x3a   : > { %309 = vadd.xlane.f32.xlu1 %v308_v11  ;;  %v320_v23 = vadd.f32 %v298_v20, %v297_v19  ;;  %v317_v24 = vadd.f32 %v296_v22, %v295_v21  ;;  %v359_v6 = vld [vmem:[%s1247_s1] sm:$0xf]  ;;  %v437_v13 = vld [vmem:[%s1249_s3 + $0x8] sm:$0xff]  ;;  %v438_v14 = vld [vmem:[%s1249_s3 + $0x10] sm:$0xff]  ;;  %s261_s14 = scalar_lea.vmem %s1251_s5, %s744_s29 }
  0x3b   : > { %303 = vadd.xlane.f32.xlu0 %v302_v12  ;;  %v277_v26 = vld [vmem:[#allocation2 + $0x10] sm:$0xff]  ;;  %v275_v27 = vld [vmem:[#allocation2] sm:$0xff]  ;;  %v439_v15 = vld [vmem:[%s1249_s3 + $0x18] sm:$0xff] }
  0x3c   : > { %v278_v32 = vld [vmem:[#allocation2 + $0x18] sm:$0xff]  ;;  %v276_v33 = vld [vmem:[#allocation2 + $0x8] sm:$0xff]  ;;  %v436_v7 = vld [vmem:[%s1249_s3] sm:$0xff] }
  0x3d   : > { %v280_v38 = vld [vmem:[#allocation2 + $0x28] sm:$0xff]  ;;  %v279_v39 = vld [vmem:[#allocation2 + $0x20] sm:$0xff]  ;;  %784 = vmatprep.mubr.msk.f32.mxu1 %vm452_vm3, %v436_v7  ;;  %v443_v19 = vld [vmem:[%s1249_s3 + $0x38] sm:$0xff] }
  0x3e   : > { %315 = vadd.xlane.f32.xlu1 %v314_v17  ;;  %v282_v44 = vld [vmem:[#allocation2 + $0x38] sm:$0xff]  ;;  %v281_v45 = vld [vmem:[#allocation2 + $0x30] sm:$0xff]  ;;  %v360_v8 = vld [vmem:[%s1248_s2] sm:$0xf] }
  0x3f   : > { %312 = vadd.xlane.f32.xlu0 %v311_v18  ;;  %v440_v16 = vld [vmem:[%s1249_s3 + $0x20] sm:$0xff]  ;;  %v441_v17 = vld [vmem:[%s1249_s3 + $0x28] sm:$0xff]  ;;  %v442_v18 = vld [vmem:[%s1249_s3 + $0x30] sm:$0xff] }
  0x40   : > { %v445_v20 = vld [vmem:[%s1250_s4 + $0x8] sm:$0xff]  ;;  %v444_v21 = vld [vmem:[%s1250_s4] sm:$0xff] }
  0x42   : > { %321 = vadd.xlane.f32.xlu1 %v320_v23 }
  0x43   : > { %318 = vadd.xlane.f32.xlu0 %v317_v24 }
  0xc3   : > { %v307_v28 = vpop.xlane.xlu1 %306 }
  0xc4   : > { %v325_v29 = vadd.f32 %v307_v28, %v277_v26  ;;  %v301_v30 = vpop.xlane.xlu0 %300  ;;  %v447_v26 = vld [vmem:[%s1250_s4 + $0x18] sm:$0xff]  ;;  %v446_v28 = vld [vmem:[%s1250_s4 + $0x10] sm:$0xff] }
  0xc5   : > { %v323_v31 = vadd.f32 %v301_v30, %v275_v27 }
  0xc6   : > { %334 = vst.msk [vmem:[#allocation2 + $0x10] sm:$0xff] %vm266_vm0, %v325_v29 }
  0xc7   : > { %332 = vst.msk [vmem:[#allocation2] sm:$0xff] %vm266_vm0, %v323_v31  ;;  %v310_v34 = vpop.xlane.xlu1 %309 }
  0xc8   : > { %v326_v35 = vadd.f32 %v310_v34, %v278_v32  ;;  %v304_v36 = vpop.xlane.xlu0 %303 }
  0xc9   : > { %v324_v37 = vadd.f32 %v304_v36, %v276_v33  ;;  %v449_v36 = vld [vmem:[%s1250_s4 + $0x28] sm:$0xff] }
  0xca   : > { %335 = vst.msk [vmem:[#allocation2 + $0x18] sm:$0xff] %vm266_vm0, %v326_v35 }
  0xcb   : > { %333 = vst.msk [vmem:[#allocation2 + $0x8] sm:$0xff] %vm266_vm0, %v324_v37  ;;  %v316_v40 = vpop.xlane.xlu1 %315 }
  0xcc   : > { %v328_v41 = vadd.f32 %v316_v40, %v280_v38  ;;  %v313_v42 = vpop.xlane.xlu0 %312  ;;  %v448_v38 = vld [vmem:[%s1250_s4 + $0x20] sm:$0xff] }
  0xcd   : > { %v327_v43 = vadd.f32 %v313_v42, %v279_v39  ;;  %v345_v52 = vld [vmem:[#allocation2 + $0x10] sm:$0xff] }
  0xce   : > { %337 = vst.msk [vmem:[#allocation2 + $0x28] sm:$0xff] %vm266_vm0, %v328_v41  ;;  %v343_v49 = vld [vmem:[#allocation2] sm:$0xff]  ;;  %v353_v57 = vmul.f32 0.00390625, %v345_v52 }
  0xcf   : > { %336 = vst.msk [vmem:[#allocation2 + $0x20] sm:$0xff] %vm266_vm0, %v327_v43  ;;  %v322_v46 = vpop.xlane.xlu1 %321  ;;  %v351_v54 = vmul.f32 0.00390625, %v343_v49 }
  0xd0   : > { %v330_v47 = vadd.f32 %v322_v46, %v282_v44  ;;  %v319_v48 = vpop.xlane.xlu0 %318  ;;  %v451_v46 = vld [vmem:[%s1250_s4 + $0x38] sm:$0xff] }
  0xd1   : > { %v329_v50 = vadd.f32 %v319_v48, %v281_v45  ;;  %v346_v53 = vld [vmem:[#allocation2 + $0x18] sm:$0xff]  ;;  %v450_v48 = vld [vmem:[%s1250_s4 + $0x30] sm:$0xff] }
  0xd2   : > { %339 = vst.msk [vmem:[#allocation2 + $0x38] sm:$0xff] %vm266_vm0, %v330_v47  ;;  %v344_v51 = vld [vmem:[#allocation2 + $0x8] sm:$0xff]  ;;  %v354_v58 = vmul.f32 0.00390625, %v346_v53 }
  0xd3   : > { %338 = vst.msk [vmem:[#allocation2 + $0x30] sm:$0xff] %vm266_vm0, %v329_v50  ;;  %v352_v55 = vmul.f32 0.00390625, %v344_v51 }
  0xd4   : > { %v800_v63 = vpack.c.bf16 %v354_v58, %v353_v57 }
  0xd5   : > { %v797_v56 = vpack.c.bf16 %v352_v55, %v351_v54  ;;  %v348_v59 = vld [vmem:[#allocation2 + $0x28] sm:$0xff] }
  0xd6   : > { %v347_v60 = vld [vmem:[#allocation2 + $0x20] sm:$0xff]  ;;  %v356_v62 = vmul.f32 0.00390625, %v348_v59 }
  0xd7   : > { %798 = vmatpush3.bf16.msra.mxu0 %v797_v56  ;;  %v355_v61 = vmul.f32 0.00390625, %v347_v60 }
  0xd8   : > { %799 = vmatprep.subr.bf16.mxu0 %v986_v25 }
  0xd9   : > { %v350_v0 = vld [vmem:[#allocation2 + $0x38] sm:$0xff]  ;;  %v803_v2 = vpack.c.bf16 %v356_v62, %v355_v61 }
  0xda   : > { %v349_v1 = vld [vmem:[#allocation2 + $0x30] sm:$0xff]  ;;  %v358_v4 = vmul.f32 0.00390625, %v350_v0 }
  0xdb   : > { %801 = vmatpush3.bf16.msra.mxu0 %v800_v63  ;;  %v357_v3 = vmul.f32 0.00390625, %v349_v1 }
  0xdc   : > { %802 = vmatprep.subr.bf16.mxu0 %v986_v25 }
  0xdd   : > { %v806_v5 = vpack.c.bf16 %v358_v4, %v357_v3 }
  0xdf   : > { %804 = vmatpush3.bf16.msra.mxu0 %v803_v2 }
  0xe0   : > { %805 = vmatprep.subr.bf16.mxu0 %v986_v25 }
  0xe3   : > { %807 = vmatpush3.bf16.msra.mxu0 %v806_v5 }
  0xe6   : > { %780 = vmatmul.mubr.msk.f32.vlgmr.msra.gmra.mrb[0].mxu0 %vm361_vm2, %v359_v6 }
 0x1b9   : > { %v431_v9 = vpop.f32.mrb[0].mxu0 }
 0x1ba   : > { %v432_v10 = vadd.f32 %v431_v9, %v360_v8  ;;  %v781_v11 = vpop.f32.mrb[1].mxu0 }
 0x1bc   : > { %v435_v12 = vmax.f32 %v432_v10, 0.0 }
 0x1be   : > { %782 = vmatprep.subr.msk.mxu1 %vm477_vm4, %v435_v12 }
 0x1bf   : > { %783 = vmatpush3.msk.msra.mxu1 %vm477_vm4, %v435_v12 }
 0x1c0   : > { %785 = vmatmul.mubr.msk.f32.vlgmr.msra.gmra.mrb[0].mxu1 %vm452_vm3, %v437_v13 }
 0x1c1   : > { %787 = vmatprep.mubr.msk.f32.mxu1 %vm452_vm3, %v438_v14 }
 0x1c4   : > { %788 = vmatmul.mubr.msk.f32.gmra.mrb[2].mxu1 %vm452_vm3, %v439_v15 }
 0x1c5   : > { %790 = vmatprep.mubr.msk.f32.mxu1 %vm452_vm3, %v440_v16 }
 0x1c8   : > { %791 = vmatmul.mubr.msk.f32.gmra.mrb[4].mxu1 %vm452_vm3, %v441_v17 }
 0x1c9   : > { %793 = vmatprep.mubr.msk.f32.mxu1 %vm452_vm3, %v442_v18 }
 0x1cc   : > { %794 = vmatmul.mubr.msk.f32.gmra.mrb[6].mxu1 %vm452_vm3, %v443_v19 }
 0x293   : > { %v786_v22 = vpop.f32.mrb[0].mxu1 }
 0x294   : > { %v553_v23 = vadd.f32 %v786_v22, %v445_v20  ;;  %v547_v24 = vpop.f32.mrb[1].mxu1 }
 0x295   : > { %v548_v25 = vadd.f32 %v547_v24, %v444_v21 }
 0x296   : > { %v587_v27 = vsub.f32 0.0, %v553_v23 }
 0x297   : > { %v586_v29 = vsub.f32 0.0, %v548_v25  ;;  %v789_v30 = vpop.f32.mrb[2].mxu1 }
 0x298   : > { %v596_v31 = vmul.f32 1.442695, %v587_v27  ;;  %v563_v32 = vadd.f32 %v789_v30, %v447_v26  ;;  %v557_v33 = vpop.f32.mrb[3].mxu1 }
 0x299   : > { %v594_v34 = vmul.f32 1.442695, %v586_v29  ;;  %v558_v35 = vadd.f32 %v557_v33, %v446_v28 }
 0x29a   : > { %868 = vpow2.f32 %v596_v31  ;;  %v589_v37 = vsub.f32 0.0, %v563_v32 }
 0x29b   : > { %870 = vpow2.f32 %v594_v34  ;;  %v588_v39 = vsub.f32 0.0, %v558_v35  ;;  %v792_v40 = vpop.f32.mrb[4].mxu1 }
 0x29c   : > { %v600_v41 = vmul.f32 1.442695, %v589_v37  ;;  %v573_v42 = vadd.f32 %v792_v40, %v449_v36  ;;  %v567_v43 = vpop.f32.mrb[5].mxu1 }
 0x29d   : > { %v598_v44 = vmul.f32 1.442695, %v588_v39  ;;  %v568_v45 = vadd.f32 %v567_v43, %v448_v38 }
 0x29e   : > { %872 = vpow2.f32 %v600_v41  ;;  %v591_v47 = vsub.f32 0.0, %v573_v42 }
 0x29f   : > { %874 = vpow2.f32 %v598_v44  ;;  %v590_v49 = vsub.f32 0.0, %v568_v45  ;;  %v795_v50 = vpop.f32.mrb[6].mxu1 }
 0x2a0   : > { %v604_v51 = vmul.f32 1.442695, %v591_v47  ;;  %v583_v52 = vadd.f32 %v795_v50, %v451_v46  ;;  %v577_v53 = vpop.f32.mrb[7].mxu1 }
 0x2a1   : > { %v602_v54 = vmul.f32 1.442695, %v590_v49  ;;  %v578_v55 = vadd.f32 %v577_v53, %v450_v48 }
 0x2a2   : > { %876 = vpow2.f32 %v604_v51  ;;  %v593_v56 = vsub.f32 0.0, %v583_v52 }
 0x2a3   : > { %878 = vpow2.f32 %v602_v54  ;;  %v592_v57 = vsub.f32 0.0, %v578_v55 }
 0x2a4   : > { %v869_v58 = vpop.eup %868  ;;  %v608_v59 = vmul.f32 1.442695, %v593_v56 }
 0x2a5   : > { %v871_v60 = vpop.eup %870  ;;  %v611_v61 = vadd.f32 1.0, %v869_v58  ;;  %v606_v62 = vmul.f32 1.442695, %v592_v57 }
 0x2a6   : > { %v610_v63 = vadd.f32 1.0, %v871_v60  ;;  %880 = vpow2.f32 %v608_v59 }
 0x2a7   : > { %882 = vrcp.f32 %v611_v61 }
 0x2a8   : > { %v873_v0 = vpop.eup %872  ;;  %884 = vrcp.f32 %v610_v63 }
 0x2a9   : > { %v875_v1 = vpop.eup %874  ;;  %v613_v2 = vadd.f32 1.0, %v873_v0  ;;  %886 = vpow2.f32 %v606_v62 }
 0x2aa   : > { %v612_v3 = vadd.f32 1.0, %v875_v1 }
 0x2ab   : > { %888 = vrcp.f32 %v613_v2 }
 0x2ac   : > { %v877_v4 = vpop.eup %876  ;;  %890 = vrcp.f32 %v612_v3 }
 0x2ad   : > { %v879_v5 = vpop.eup %878  ;;  %v615_v6 = vadd.f32 1.0, %v877_v4 }
 0x2ae   : > { %v614_v7 = vadd.f32 1.0, %v879_v5 }
 0x2af   : > { %892 = vrcp.f32 %v615_v6 }
 0x2b0   : > { %v881_v8 = vpop.eup %880  ;;  %894 = vrcp.f32 %v614_v7 }
 0x2b1   : > { %v883_v9 = vpop.eup %882  ;;  %v617_v10 = vadd.f32 1.0, %v881_v8 }
 0x2b2   : > { %v885_v11 = vpop.eup %884  ;;  %635 = vst.msk [vmem:[%s261_s14 + $0x8] sm:$0xff] %vm266_vm0, %v883_v9 }
 0x2b3   : > { %v887_v12 = vpop.eup %886  ;;  %634 = vst.msk [vmem:[%s261_s14] sm:$0xff] %vm266_vm0, %v885_v11  ;;  %896 = vrcp.f32 %v617_v10 }
 0x2b4   : > { %v616_v13 = vadd.f32 1.0, %v887_v12 }
 0x2b5   : > { %v889_v14 = vpop.eup %888 }
 0x2b6   : > { %v891_v15 = vpop.eup %890  ;;  %637 = vst.msk [vmem:[%s261_s14 + $0x18] sm:$0xff] %vm266_vm0, %v889_v14  ;;  %898 = vrcp.f32 %v616_v13 }
 0x2b7   : > { %636 = vst.msk [vmem:[%s261_s14 + $0x10] sm:$0xff] %vm266_vm0, %v891_v15 }
 0x2b9   : > { %v893_v16 = vpop.eup %892 }
 0x2ba   : > { %v895_v17 = vpop.eup %894  ;;  %639 = vst.msk [vmem:[%s261_s14 + $0x28] sm:$0xff] %vm266_vm0, %v893_v16 }
 0x2bb   : > { %638 = vst.msk [vmem:[%s261_s14 + $0x20] sm:$0xff] %vm266_vm0, %v895_v17 }
 0x2bd   : > { %v897_v18 = vpop.eup %896 }
 0x2be   : > { %641 = vst.msk [vmem:[%s261_s14 + $0x38] sm:$0xff] %vm266_vm0, %v897_v18 }
 0x2c0   : > { %v899_v19 = vpop.eup %898 }
 0x2c1   : > { %640 = vst.msk [vmem:[%s261_s14 + $0x30] sm:$0xff] %vm266_vm0, %v899_v19 }
 0x2c2 PF: > { %s18_s23 = sadd.s32 1, %s980_s23   ;;  %s1255_s18 = smov %s964_s19 }
 0x2c3   : > { %p15_p9 = scmp.ge.s32.totalorder %s18_s23, 4   ;;  %s1256_s19 = smov %s968_s20 }
 0x2c4   : > { %s1257_s20 = smov %s1067_s30  ;;  %s1258_s21 = smov %s976_s22 }
 0x2c5   : > { %s1259_s22 = smov %s1261_s25  ;;  %17 = sbr.rel (!%p15_p9) target bundleno = 4 (0x4), region = 88 }
 0x2cc   :  { %663 = vsyncpa [#allocation4], 1 }
 0x2cd   :  { %665 = vsyncpa [#allocation4 + $0x1], 1 }

</bundles_post_ra>
